<compile_context>
chip_gen: v7x
topology: tpu7x:2x2x1
jax: 0.10.0
libtpu: 0.0.40
codegen_flags: <defaults>
</compile_context>

<pallas_src>
import functools
import numpy as np
import jax
import jax.numpy as jnp
from jax.experimental import pallas as pl
from jax.experimental.pallas import tpu as pltpu


def _round_up(x, m):
    return ((x + m - 1) // m) * m


def _tpu_defaults():
    """(frame_tile, vmem_limit_bytes): conservative everywhere, larger on 128 MiB parts."""
    tile_f, vmem = 128, 48 * 1024 * 1024               # safe for v7x (64 MiB VMEM) / unknown
    try:
        info = pltpu.get_tpu_info()
        if getattr(info, "vmem_capacity_bytes", 0) >= 100 * 1024 * 1024:   # v5e / v6e
            tile_f, vmem = 256, 96 * 1024 * 1024
    except Exception:
        pass
    return tile_f, vmem


# ---------------------------------------------------------------------------
# Pallas kernels
# ---------------------------------------------------------------------------

def _combtooth_kernel(rot_ref, f0_ref, out_ref, *, sampling_rate):
    # layout: (rows_tile, 128) lane/sublane-dense block over the flattened (B*T,) signal.
    f0 = f0_ref[...]
    # TODO(synk): pl.reciprocal(approx=True) would push this divide to the EUP, but it has
    # no CPU-interpret lowering; plain divide keeps the kernel portable.
    x = sampling_rate * rot_ref[...] / (f0 + 0.001)
    px = jnp.pi * x
    small = jnp.abs(px) < 1e-6
    safe = jnp.where(small, 1.0, px)
    sinc = jnp.where(small, 1.0, jnp.sin(safe) / safe)        # torch.sinc semantics
    out_ref[...] = jnp.where(f0 > 0.0, sinc, 0.0)             # combtooth[f0 <= 0] = 0


def _dsp_kernel(comb_ref, cond_ref, w_ref, b_ref, win_ref, fwd_ref, inv_ref, out_ref,
                *, seed, block_size, sig_len):
    # layout per grid step (b, frame-tile):
    #   comb (1, tf, N) f32;  cond (1, tf, Din_p) f32;  w (Din_p, 3*Kp) bf16;  b (1, 1, 3*Kp) f32
    #   win (1, N) f32;  fwd (N, 2*Kp) bf16 [cos | -sin];  inv (2*Kp, N) bf16 [wk/N*cos ; -wk/N*sin]
    _, tf, N = comb_ref.shape
    Kp = fwd_ref.shape[1] // 2
    b = pl.program_id(0)
    ft = pl.program_id(1)

    # --- fused Unit2Control stand-in projection (bf16 MXU operands, f32 accumulation) ---
    ctrl = jnp.dot(cond_ref[0].astype(jnp.bfloat16), w_ref[...],
                   preferred_element_type=jnp.float32) + b_ref[0]          # (tf, 3*Kp)

    # --- uniform noise in [-1, 1), hashed from the absolute padded-sample index so that
    #     the overlapping halves of adjacent frames share the exact same noise samples.
    #     Pure int32 VPU ops: portable to Mosaic and the CPU interpreter.
    row = jax.lax.broadcasted_iota(jnp.int32, (tf, N), 0) + ft * tf        # global frame idx
    col = jax.lax.broadcasted_iota(jnp.int32, (tf, N), 1)
    abs_idx = row * block_size + col                                       # idx in padded signal
    h = abs_idx + b * jnp.int32(0x27D4EB2F) + jnp.int32(seed) * jnp.int32(0x165667B1)
    h = h ^ jax.lax.shift_right_logical(h, 16)
    h = h * jnp.int32(0x7FEB352D)
    h = h ^ jax.lax.shift_right_logical(h, 15)
    h = h * jnp.int32(-2073319797)                                         # 0x846CA68B as int32
    h = h ^ jax.lax.shift_right_logical(h, 16)
    mant = (h & jnp.int32(0xFFFFFF)).astype(jnp.float32)                   # 24 random bits
    noise = mant * (2.0 / float(1 << 24)) - 1.0
    valid = (abs_idx >= block_size) & (abs_idx < sig_len + block_size)     # torch zero-pads noise
    noise = jnp.where(valid, noise, 0.0)

    w = win_ref[...]                                                       # (1, N) sqrt-hann
    cw = (comb_ref[0] * w).astype(jnp.bfloat16)                            # windowed combtooth
    nw = (noise * w).astype(jnp.bfloat16)                                  # windowed noise

    # rfft as one fused bf16 matmul per signal:  X = x @ [cos | -sin]  ->  [Re | Im]
    fwd = fwd_ref[...]
    c_spec = jnp.dot(cw, fwd, preferred_element_type=jnp.float32)          # (tf, 2*Kp)
    n_spec = jnp.dot(nw, fwd, preferred_element_type=jnp.float32)
    c_re, c_im = c_spec[:, :Kp], c_spec[:, Kp:]
    n_re, n_im = n_spec[:, :Kp], n_spec[:, Kp:]

    # src_filter = exp(harmo_mag + i*pi*harmo_phase);  noise_filter = exp(noise_mag)/128
    amp = jnp.exp(ctrl[:, :Kp])
    ph = jnp.float32(np.pi) * ctrl[:, Kp:2 * Kp]
    src_re = amp * jnp.cos(ph)
    src_im = amp * jnp.sin(ph)
    nf = jnp.exp(ctrl[:, 2 * Kp:]) * (1.0 / 128.0)

    sig_re = (c_re * src_re - c_im * src_im + n_re * nf).astype(jnp.bfloat16)
    sig_im = (c_re * src_im + c_im * src_re + n_im * nf).astype(jnp.bfloat16)

    # irfft as two accumulating bf16 matmuls (no concat copy; f32 accumulation)
    y = (jnp.dot(sig_re, inv_ref[:Kp, :], preferred_element_type=jnp.float32) +
         jnp.dot(sig_im, inv_ref[Kp:, :], preferred_element_type=jnp.float32))   # (tf, N)
    out_ref[0] = y * w                                      # window again before overlap-add


# ---------------------------------------------------------------------------
# Pallas wrappers
# ---------------------------------------------------------------------------

def combtooth_pallas(rot, f0, sampling_rate, tile_rows=512):
    B, T = rot.shape
    total = B * T
    lanes = 128
    rows = _round_up(total, lanes) // lanes
    tr = min(int(tile_rows), _round_up(rows, 8))
    rows_p = _round_up(rows, tr)
    pad = rows_p * lanes - total
    rot_f = jnp.pad(rot.reshape(-1), (0, pad)).reshape(rows_p, lanes)
    f0_f = jnp.pad(f0.reshape(-1), (0, pad)).reshape(rows_p, lanes)   # padded f0=0 -> output 0
    out = pl.pallas_call(
        functools.partial(_combtooth_kernel, sampling_rate=float(sampling_rate)),
        out_shape=jax.ShapeDtypeStruct((rows_p, lanes), jnp.float32),
        grid=(rows_p // tr,),
        in_specs=[pl.BlockSpec((tr, lanes), lambda i: (i, 0)),
                  pl.BlockSpec((tr, lanes), lambda i: (i, 0))],
        out_specs=pl.BlockSpec((tr, lanes), lambda i: (i, 0)),
        compiler_params=pltpu.CompilerParams(dimension_semantics=("parallel",)),
    )(rot_f, f0_f)
    return out.reshape(-1)[:total].reshape(B, T)


def dsp_pallas(comb_frames, cond_ext, w, bias, window, fwd_basis, inv_basis,
               *, noise_seed, block_size, sig_len, tile_f=None):
    B, F1, N = comb_frames.shape
    Din_p = cond_ext.shape[-1]
    Dout_p = w.shape[-1]
    Kp2 = fwd_basis.shape[1]
    tf_default, vmem_limit = _tpu_defaults()
    tf = min(int(tile_f) if tile_f else tf_default, _round_up(F1, 8))
    F1p = _round_up(F1, tf)
    if F1p != F1:
        comb_frames = jnp.pad(comb_frames, ((0, 0), (0, F1p - F1), (0, 0)))
        cond_ext = jnp.pad(cond_ext, ((0, 0), (0, F1p - F1), (0, 0)))
    out = pl.pallas_call(
        functools.partial(_dsp_kernel, seed=int(noise_seed),
                          block_size=int(block_size), sig_len=int(sig_len)),
        out_shape=jax.ShapeDtypeStruct((B, F1p, N), jnp.float32),
        grid=(B, F1p // tf),
        in_specs=[pl.BlockSpec((1, tf, N), lambda b_, f_: (b_, f_, 0)),
                  pl.BlockSpec((1, tf, Din_p), lambda b_, f_: (b_, f_, 0)),
                  # TODO(synk): pipeline_mode=pl.Buffered(1) on the grid-invariant operands
                  # below would drop their second pipeline buffer (extra headroom on v7x).
                  pl.BlockSpec((Din_p, Dout_p), lambda b_, f_: (0, 0)),
                  pl.BlockSpec((1, 1, Dout_p), lambda b_, f_: (b_, 0, 0)),
                  pl.BlockSpec((1, N), lambda b_, f_: (0, 0)),
                  pl.BlockSpec((N, Kp2), lambda b_, f_: (0, 0)),
                  pl.BlockSpec((Kp2, N), lambda b_, f_: (0, 0))],
        out_specs=pl.BlockSpec((1, tf, N), lambda b_, f_: (b_, f_, 0)),
        compiler_params=pltpu.CompilerParams(
            dimension_semantics=("parallel", "parallel"),
            vmem_limit_bytes=vmem_limit),
    )(comb_frames, cond_ext, w, bias, window, fwd_basis, inv_basis)
    return out[:, :F1, :] if F1p != F1 else out


# ---------------------------------------------------------------------------
# Module
# ---------------------------------------------------------------------------

def upsample_linear(f0_frames, factor):
    # Matches DDSP upsample: append last frame, linear interp (align_corners), drop the tail.
    B, F_, _ = f0_frames.shape
    x = jnp.concatenate([f0_frames[:, :, 0], f0_frames[:, -1:, 0]], axis=1)   # (B, F+1)
    pos = jnp.arange(F_ * factor, dtype=jnp.float32) / factor
    i0 = jnp.floor(pos).astype(jnp.int32)
    frac = pos - i0.astype(jnp.float32)
    out = x[:, i0] * (1.0 - frac)[None, :] + x[:, i0 + 1] * frac[None, :]
    return out[..., None]                                                     # (B, F*factor, 1)


class CombSubFast:
    def __init__(self, sampling_rate, block_size, n_unit=256, n_spk=1, seed=0):
        self.sampling_rate = float(sampling_rate)
        self.block_size = int(block_size)
        bs = self.block_size
        N, K = 2 * bs, bs + 1
        Kp = _round_up(K, 128)                    # lane-pad the ragged rDFT bin dim
        self.N, self.K, self.Kp = N, K, Kp

        # sqrt(hann_window(2*block_size)) (periodic, torch default)
        n = np.arange(N)
        self.window = jnp.asarray(np.sqrt(0.5 * (1.0 - np.cos(2.0 * np.pi * n / N))),
                                  dtype=jnp.float32).reshape(1, N)

        # Fused, lane-padded real-DFT bases (padded columns/rows are zero), both bf16:
        #   forward (N, 2*Kp):  x @ [cos | -sin]  = [Re | Im]
        #   inverse (2*Kp, N):  [Re | Im] @ [wk/N*cos ; -wk/N*sin] = irfft
        k = np.arange(K)
        ang = 2.0 * np.pi * n[:, None] * k[None, :] / N
        fwd = np.zeros((N, 2 * Kp), dtype=np.float32)
        fwd[:, :K] = np.cos(ang)
        fwd[:, Kp:Kp + K] = -np.sin(ang)
        self.fwd_basis = jnp.asarray(fwd, dtype=jnp.bfloat16)
        wk = np.full((K,), 2.0)
        wk[0] = 1.0
        wk[-1] = 1.0
        ang_i = 2.0 * np.pi * k[:, None] * n[None, :] / N
        inv = np.zeros((2 * Kp, N), dtype=np.float32)
        inv[:K, :] = (wk[:, None] / N) * np.cos(ang_i)
        inv[Kp:Kp + K, :] = -(wk[:, None] / N) * np.sin(ang_i)
        self.inv_basis = jnp.asarray(inv, dtype=jnp.bfloat16)   # bf16 MXU operand (f32 acc)

        # TODO(synk): the real Unit2Control is a conformer stack (source not provided);
        # stand-in is a single deterministic dense layer over [units, f0, volume, sin/cos(phase)]
        # fused into the DSP kernel.
        Din = n_unit + 4
        Din_p = _round_up(Din, 128)
        Dout_p = 3 * Kp                           # [hmag | hph | nmag], each lane-padded to Kp
        self.Din, self.Din_p, self.Dout_p = Din, Din_p, Dout_p
        k1, k2 = jax.random.split(jax.random.PRNGKey(seed), 2)
        w_dense = 0.02 * jax.random.normal(k1, (Din, 3 * K), dtype=jnp.float32)
        spk_dense = 0.02 * jax.random.normal(k2, (n_spk, 3 * K), dtype=jnp.float32)
        w_pad = jnp.zeros((Din_p, Dout_p), jnp.float32)
        spk_pad = jnp.zeros((n_spk, Dout_p), jnp.float32)
        for j in range(3):
            w_pad = w_pad.at[:Din, j * Kp:j * Kp + K].set(w_dense[:, j * K:(j + 1) * K])
            spk_pad = spk_pad.at[:, j * Kp:j * Kp + K].set(spk_dense[:, j * K:(j + 1) * K])
        self.w = w_pad.astype(jnp.bfloat16)       # bf16 MXU operand; padded entries are zero
        self.spk_emb = spk_pad
        self.b = jnp.zeros((Dout_p,), jnp.float32)

    def __call__(self, units_frames, f0_frames, volume_frames, spk_id,
                 spk_mix_dict=None, initial_phase=None, infer=True, noise_seed=1234):
        B, F_, _ = units_frames.shape
        bs, sr = self.block_size, self.sampling_rate
        T = F_ * bs

        # --- f0 upsample + phase rotation (cumsum, wrapped) ---
        # TODO(synk): torch reference accumulates phase in float64; the f32 cumsum here will
        # slowly detune very long clips (use a chunked/compensated cumsum if that matters).
        f0 = upsample_linear(f0_frames, bs)[..., 0]                 # (B, T)
        rot = jnp.cumsum(f0 / sr, axis=1)
        if initial_phase is not None:
            rot = rot + initial_phase[:, None] / (2.0 * np.pi)
        rot = rot - jnp.round(rot)
        phase_frames = 2.0 * np.pi * rot[:, ::bs]                   # (B, F)

        # --- combtooth (Pallas, lane/sublane-dense tiles over the flattened signal) ---
        combtooth = combtooth_pallas(rot, f0, sr)                   # (B, T)

        # --- conditioning features for the fused Unit2Control stand-in ---
        cond = jnp.concatenate(
            [units_frames, f0_frames, volume_frames[..., None],
             jnp.sin(phase_frames)[..., None], jnp.cos(phase_frames)[..., None]],
            axis=-1).astype(jnp.float32)                            # (B, F, Din)
        cond = jnp.pad(cond, ((0, 0), (0, 0), (0, self.Din_p - self.Din)))
        cond_ext = jnp.concatenate([cond, cond[:, -1:, :]], axis=1)  # repeat last frame (== repeating ctrl)
        bias = (self.b[None, :] + self.spk_emb[spk_id])[:, None, :]  # (B, 1, 3*Kp)

        # --- pad + split into 50%-overlap frames (first half | second half) ---
        # TODO(synk): the 2x duplication could be removed with an overlapping manual DMA from
        # the padded signal inside the DSP kernel (memory_space=pl.ANY).
        comb_p = jnp.pad(combtooth, ((0, 0), (bs, bs)))             # (B, (F+2)*bs)
        F1 = F_ + 1
        first = comb_p[:, :F1 * bs].reshape(B, F1, bs)
        second = comb_p[:, bs:].reshape(B, F1, bs)
        comb_frames = jnp.concatenate([first, second], axis=-1)     # (B, F1, 2*bs)

        # --- fused ctrl projection + window + rfft + filter + irfft + window (Pallas) ---
        out_frames = dsp_pallas(comb_frames, cond_ext, self.w, bias, self.window,
                                self.fwd_basis, self.inv_basis,
                                noise_seed=noise_seed, block_size=bs, sig_len=T)

        # --- Fold (overlap-add, stride=bs) then crop the padding ---
        # TODO(synk): could be fused into the DSP kernel output to halve its HBM writes.
        signal = (out_frames[:, 1:, :bs] + out_frames[:, :-1, bs:]).reshape(B, T)
        return signal, phase_frames[..., None], (signal, signal)


# ---------------------------------------------------------------------------
# Demo
# ---------------------------------------------------------------------------

if __name__ == "__main__":
    B, F_, n_unit, block_size, sampling_rate = 2, 8, 32, 16, 16000
    key = jax.random.PRNGKey(0)
    k_u, k_f, k_v = jax.random.split(key, 3)
    units = jax.random.normal(k_u, (B, F_, n_unit), dtype=jnp.float32)
    f0_frames = 100.0 + 80.0 * jax.random.uniform(k_f, (B, F_, 1), dtype=jnp.float32)
    f0_frames = f0_frames.at[0, 0, 0].set(0.0)   # exercise the unvoiced (f0 <= 0) mask
    volume = jax.random.uniform(k_v, (B, F_), dtype=jnp.float32)
    spk_id = jnp.zeros((B,), dtype=jnp.int32)

    model = CombSubFast(sampling_rate, block_size, n_unit=n_unit, n_spk=1, seed=0)
    signal, phase_frames, (s1, s2) = model(units, f0_frames, volume, spk_id, noise_seed=1234)
    jax.block_until_ready(signal)
    jax.block_until_ready(phase_frames)

    assert signal.shape == (B, F_ * block_size)
    assert phase_frames.shape == (B, F_, 1)
    assert bool(jnp.all(jnp.isfinite(signal)))
    print("KERNEL_OK")
</pallas_src>

<mosaic_0001>
module attributes {stable_mosaic.version = 11 : i64} {
  func.func @_combtooth_kernel(%arg0: i32, %arg1: memref<8x128xf32, #tpu.memory_space<vmem>>, %arg2: memref<8x128xf32, #tpu.memory_space<vmem>>, %arg3: memref<8x128xf32, #tpu.memory_space<vmem>>) attributes {dimension_semantics = [#tpu.dimension_semantics<parallel>], iteration_bounds = array<i64: 1>, scalar_prefetch = 0 : i64, scratch_operands = 0 : i64, tpu.core_type = #tpu.core_type<tc>, window_params = [{transform_indices = @transform_0, window_bounds = array<i64: 8, 128>}, {transform_indices = @transform_1, window_bounds = array<i64: 8, 128>}, {transform_indices = @transform_2, window_bounds = array<i64: 8, 128>}]} {
    %c0 = arith.constant 0 : index
    %c0_0 = arith.constant 0 : index
    %0 = vector.load %arg2[%c0, %c0_0] : memref<8x128xf32, #tpu.memory_space<vmem>>, vector<8x128xf32>
    %c0_1 = arith.constant 0 : index
    %c0_2 = arith.constant 0 : index
    %1 = vector.load %arg1[%c0_1, %c0_2] : memref<8x128xf32, #tpu.memory_space<vmem>>, vector<8x128xf32>
    %cst = arith.constant 1.600000e+04 : f32
    %2 = vector.broadcast %cst : f32 to vector<8x128xf32>
    %3 = arith.mulf %2, %1 : vector<8x128xf32>
    %cst_3 = arith.constant 1.000000e-03 : f32
    %4 = vector.broadcast %cst_3 : f32 to vector<8x128xf32>
    %5 = arith.addf %0, %4 : vector<8x128xf32>
    %6 = arith.divf %3, %5 : vector<8x128xf32>
    %cst_4 = arith.constant 3.14159274 : f32
    %7 = vector.broadcast %cst_4 : f32 to vector<8x128xf32>
    %8 = arith.mulf %7, %6 : vector<8x128xf32>
    %9 = math.absf %8 : vector<8x128xf32>
    %cst_5 = arith.constant 9.99999997E-7 : f32
    %10 = vector.broadcast %cst_5 : f32 to vector<8x128xf32>
    %11 = arith.cmpf olt, %9, %10 : vector<8x128xf32>
    %cst_6 = arith.constant 1.000000e+00 : f32
    %12 = vector.broadcast %cst_6 : f32 to vector<8x128xf32>
    %13 = arith.select %11, %12, %8 : vector<8x128xi1>, vector<8x128xf32>
    %14 = math.sin %13 : vector<8x128xf32>
    %15 = arith.divf %14, %13 : vector<8x128xf32>
    %cst_7 = arith.constant 1.000000e+00 : f32
    %16 = vector.broadcast %cst_7 : f32 to vector<8x128xf32>
    %17 = arith.select %11, %16, %15 : vector<8x128xi1>, vector<8x128xf32>
    %cst_8 = arith.constant 0.000000e+00 : f32
    %18 = vector.broadcast %cst_8 : f32 to vector<8x128xf32>
    %19 = arith.cmpf ogt, %0, %18 : vector<8x128xf32>
    %cst_9 = arith.constant 0.000000e+00 : f32
    %20 = vector.broadcast %cst_9 : f32 to vector<8x128xf32>
    %21 = arith.select %19, %17, %20 : vector<8x128xi1>, vector<8x128xf32>
    %c0_10 = arith.constant 0 : index
    %c0_11 = arith.constant 0 : index
    %22 = vector.load %arg3[%c0_10, %c0_11] : memref<8x128xf32, #tpu.memory_space<vmem>>, vector<8x128xf32>
    tpu.vector_store %arg3[%c0_10, %c0_11], %21 {strides = array<i32>} : memref<8x128xf32, #tpu.memory_space<vmem>>, vector<8x128xf32>,
    return
  }
  func.func @transform_0(%arg0: i32) -> (i32, i32) {
    %c0_i32 = arith.constant 0 : i32
    %c0_i32_0 = arith.constant 0 : i32
    return %arg0, %c0_i32 : i32, i32
  }
  func.func @transform_1(%arg0: i32) -> (i32, i32) {
    %c0_i32 = arith.constant 0 : i32
    %c0_i32_0 = arith.constant 0 : i32
    return %arg0, %c0_i32 : i32, i32
  }
  func.func @transform_2(%arg0: i32) -> (i32, i32) {
    %c0_i32 = arith.constant 0 : i32
    %c0_i32_0 = arith.constant 0 : i32
    return %arg0, %c0_i32 : i32, i32
  }
}

</mosaic_0001>

<bundles_post_ra>
// kernel: tpu_custom_call.1
= control target key start
LH: loop header
LB: loop body
LE: loop exit
PB: predicated region body
PF: predicated region fallthrough
CT: control target
= control target key end

     0   :  { %7 = vsyncpa [#allocation3], 0  ;;  %s363_s0 = inlined_call_operand.hbm [shape: f32[8,128], index: 0, kind: input, shape index: {}]   ;;  %s364_s1 = inlined_call_operand.hbm [shape: f32[8,128], index: 1, kind: input, shape index: {}]   ;;  %s365_s2 = inlined_call_operand.hbm [shape: f32[8,128], index: 2, kind: output, shape index: {}]  }
   0x1   :  { %8 = vsyncpa [#allocation6], 0 }
   0x2   :  { %9 = vsyncpa [#allocation4], 0  ;;  %s269_s9 = smov [#allocation2]   ;;  %s270_s11 = smov [#allocation5]  }
   0x3   :  { %s16_s10 = sshll.u32 %s269_s9, 4  ;;  %s26_s12 = sshll.u32 %s270_s11, 4  ;;  %s17_s10 = int_to_ptr.vmem [resolvable:$true] %s16_s10  ;;  %s27_s12 = int_to_ptr.vmem [resolvable:$true] %s26_s12 }
   0x4   :  { %s197_s15 = scalar_lea.hbm %s363_s0, 128 }
   0x5   :  { %p198_p0 = scmp.ne.s32.totalorder %s363_s0, %s197_s15  ;;  %p201_p1 = scmp.lt.u32.totalorder %s197_s15, %s363_s0 }
   0x7   :  { %p203_p2 = pnand %p201_p1, %p198_p0 }
   0x9   :  { %206 = shalt.err (!%p203_p2)
}
   0xa   :  { %s207_s20 = scalar_lea.vmem %s17_s10, 128  ;;  %p212_p4 = scmp.lt.s32.totalorder %s17_s10, %s17_s10 }
   0xb   :  { %p208_p3 = scmp.ne.s32.totalorder %s17_s10, %s207_s20  ;;  %p213_p5 = scmp.lt.s32.totalorder %s207_s20, %s207_s20 }
   0xd   :  { %p214_p6 = por %p213_p5, %p212_p4 }
   0xf   :  { %p215_p7 = pnand %p214_p6, %p208_p3 }
  0x11   :  { %218 = shalt.err (!%p215_p7)
}
  0x12   :  { %19 = dma.hbm_to_vmem [thread:$0]  %s363_s0, 128, %s17_s10, [#allocation3]  }
  0x13   :  { %s219_s25 = scalar_lea.hbm %s364_s1, 128 }
  0x14   :  { %p220_p8 = scmp.ne.s32.totalorder %s364_s1, %s219_s25  ;;  %p223_p9 = scmp.lt.u32.totalorder %s219_s25, %s364_s1 }
  0x16   :  { %p225_p10 = pnand %p223_p9, %p220_p8 }
  0x18   :  { %228 = shalt.err (!%p225_p10)
}
  0x19   :  { %s229_s30 = scalar_lea.vmem %s27_s12, 128  ;;  %p234_p12 = scmp.lt.s32.totalorder %s27_s12, %s27_s12 }
  0x1a   :  { %p230_p11 = scmp.ne.s32.totalorder %s27_s12, %s229_s30  ;;  %p235_p13 = scmp.lt.s32.totalorder %s229_s30, %s229_s30 }
  0x1c   :  { %p236_p0 = por %p235_p13, %p234_p12 }
  0x1e   :  { %p237_p1 = pnand %p236_p0, %p230_p11 }
  0x20   :  { %240 = shalt.err (!%p237_p1)
}
  0x21   :  { %29 = dma.hbm_to_vmem [thread:$0]  %s364_s1, 128, %s27_s12, [#allocation6]  }
  0x22   :  { %263 = dma.done.wait [#allocation3], 128  }
  0x23   :  { %264 = vsyncadd [#allocation3], 4294967168 }
  0x24   :  { %265 = dma.done.wait [#allocation6], 128  }
  0x25   :  { %266 = vsyncadd [#allocation6], 4294967168  ;;  %v317_v0 = vld [vmem:[#allocation5] sm:$0xff]  ;;  %v37_v2 = vld [vmem:[#allocation2] sm:$0xff]  ;;  %v271_v21 = vmov 683565275  }
  0x26   :  { %v39_v1 = vadd.f32 0.001, %v317_v0  ;;  %v38_v3 = vmul.f32 16000.0, %v37_v2  ;;  %v272_v23 = vmov 2475754826   ;;  %s277_s1 = smov [#allocation7]  }
  0x27   :  { %v273_v25 = vmov 2131351028   ;;  %v274_v27 = vmov 2102212464   ;;  %v275_v29 = vmov 920167782  }
  0x28   :  { %189 = vrcp.f32 %v39_v1  ;;  %v276_v36 = vmov 1326507024   ;;  %s162_s4 = sshll.u32 %s277_s1, 4  ;;  %vm153_vm14 = vcmp.gt.f32.partialorder %v317_v0, 0.0  ;;  %s163_s4 = int_to_ptr.vmem [resolvable:$true] %s162_s4 }
  0x29   :  { %s241_s5 = scalar_lea.vmem %s163_s4, 128  ;;  %p246_p3 = scmp.lt.s32.totalorder %s163_s4, %s163_s4 }
  0x2a   :  { %p242_p2 = scmp.ne.s32.totalorder %s163_s4, %s241_s5  ;;  %p247_p4 = scmp.lt.s32.totalorder %s241_s5, %s241_s5 }
  0x2c   :  { %p248_p5 = por %p247_p4, %p246_p3 }
  0x2e   :  { %p249_p6 = pnand %p248_p5, %p242_p2 }
  0x32   :  { %v190_v4 = vpop.eup %189 }
  0x33   :  { %v41_v5 = vmul.f32 %v190_v4, %v38_v3 }
  0x35   :  { %v42_v6 = vmul.f32 3.1415927, %v41_v5 }
  0x37   :  { %v43_v7 = vand.u32 2147483647, %v42_v6 }
  0x39   :  { %vm320_vm0 = vcmp.lt.f32.partialorder %v43_v7, 1e-06 }
  0x3a   :  { %v326_v9 = vsel %vm320_vm0, 1.0, %v42_v6 }
  0x3b   :  { %v49_v10 = vand.u32 2139095040, %v326_v9  ;;  %v46_v12 = vand.u32 2147483647, %v326_v9  ;;  %vm48_vm8 = vcmp.lt.s32.totalorder %v326_v9, 0  ;;  %vm138_vm13 = vweird.f32 %v326_v9 }
  0x3d   :  { %v50_v11 = vshrl.u32 %v49_v10, 23  ;;  %v53_v15 = vand.u32 8388607, %v46_v12  ;;  %vm47_vm9 = vcmp.le.f32.partialorder %v46_v12, 0.7853982 }
  0x3f   :  { %v172_v13 = vadd.s32 4294967169, %v50_v11  ;;  %v54_v18 = vor.u32 8388608, %v53_v15 }
  0x41   :  { %v56_v14 = vadd.s32 1, %v172_v13  ;;  %v94_v38 = vshll.u32 %v54_v18, 8 }
  0x43   :  { %vm57_vm1 = vcmp.gt.s32.totalorder %v56_v14, 0 }
  0x44   :  { %v58_v16 = vsel %vm57_vm1, %v56_v14, 0 }
  0x45   :  { %v60_v17 = vand.u32 31, %v58_v16  ;;  %v59_v19 = vshrl.u32 %v58_v16, 5 }
  0x47   :  { %v61_v20 = vsub.s32 32, %v60_v17  ;;  %v63_v22 = vshll.u32 %v271_v21, %v60_v17  ;;  %v66_v24 = vshll.u32 %v272_v23, %v60_v17  ;;  %v69_v26 = vshll.u32 %v273_v25, %v60_v17 }
  0x48   :  { %v72_v28 = vshll.u32 %v274_v27, %v60_v17  ;;  %v75_v30 = vshll.u32 %v275_v29, %v60_v17  ;;  %vm78_vm2 = vcmp.lt.s32.totalorder %v59_v19, 1  ;;  %vm81_vm3 = vcmp.lt.s32.totalorder %v59_v19, 4 }
  0x49   :  { %v62_v31 = vshrl.u32 %v271_v21, %v61_v20  ;;  %v64_v32 = vshrl.u32 %v272_v23, %v61_v20  ;;  %v67_v33 = vshrl.u32 %v273_v25, %v61_v20  ;;  %v70_v34 = vshrl.u32 %v274_v27, %v61_v20 }
  0x4a   :  { %v73_v35 = vshrl.u32 %v275_v29, %v61_v20  ;;  %v76_v37 = vshrl.u32 %v276_v36, %v61_v20  ;;  %vm79_vm4 = vcmp.lt.s32.totalorder %v59_v19, 2  ;;  %vm80_vm5 = vcmp.lt.s32.totalorder %v59_v19, 3 }
  0x4b   :  { %v65_v39 = vor.u32 %v64_v32, %v63_v22  ;;  %v68_v40 = vor.u32 %v67_v33, %v66_v24  ;;  %v71_v41 = vor.u32 %v70_v34, %v69_v26 }
  0x4c   :  { %v74_v42 = vor.u32 %v73_v35, %v72_v28  ;;  %v77_v43 = vor.u32 %v76_v37, %v75_v30 }
  0x4d   :  { %v82_v44 = vsel %vm78_vm2, %v62_v31, %v65_v39  ;;  %v83_v45 = vsel %vm81_vm3, %v71_v41, 2102212464  ;;  %v86_v46 = vsel %vm78_vm2, %v65_v39, %v68_v40  ;;  %v90_v47 = vsel %vm78_vm2, %v68_v40, %v71_v41 }
  0x4e   :  { %v84_v48 = vsel %vm80_vm5, %v68_v40, %v83_v45  ;;  %v87_v49 = vsel %vm81_vm3, %v74_v42, 920167782  ;;  %v91_v50 = vsel %vm81_vm3, %v77_v43, 1326507024 }
  0x4f   :  { %v88_v51 = vsel %vm80_vm5, %v71_v41, %v87_v49  ;;  %v92_v52 = vsel %vm80_vm5, %v74_v42, %v91_v50  ;;  %v85_v53 = vsel %vm79_vm4, %v82_v44, %v84_v48 }
  0x50   :  { %v89_v54 = vsel %vm79_vm4, %v86_v46, %v88_v51  ;;  %v93_v55 = vsel %vm79_vm4, %v90_v47, %v92_v52  ;;  %v101_v60 = vmul.u32 %v94_v38, %v85_v53 }
  0x51   :  { %v332_v56 = vmul.u32.u64.low %v94_v38, %v93_v55  ;;  %v333_v57 = vmul.u32.u64.high %v94_v38, %v93_v55, %v332_v56  ;;  %v335_v58 = vmul.u32.u64.low %v94_v38, %v89_v54  ;;  %v336_v59 = vmul.u32.u64.high %v94_v38, %v89_v54, %v335_v58 }
  0x53   :  { %vm103_vm6 = vc.u32 %v333_v57, %v335_v58  ;;  %v104_v61 = vadd.s32 1, %v336_v59  ;;  %v102_v11 = vadd.s32 %v335_v58, %v333_v57 }
  0x55   :  { %v105_v62 = vsel %vm103_vm6, %v104_v61, %v336_v59 }
  0x56   :  { %v106_v63 = vadd.s32 %v105_v62, %v101_v60 }
  0x58   :  { %v107_v1 = vadd.s32 536870912, %v106_v63 }
  0x5a   :  { %v108_v2 = vshrl.u32 %v107_v1, 30 }
  0x5c   :  { %v109_v3 = vshll.u32 %v108_v2, 30  ;;  %v132_v24 = vsub.s32 4, %v108_v2 }
  0x5e   :  { %v110_v4 = vsub.s32 %v106_v63, %v109_v3  ;;  %v133_v27 = vsel %vm48_vm8, %v132_v24, %v108_v2 }
  0x5f   :  { %v135_v30 = vsel %vm47_vm9, 0, %v133_v27 }
  0x60   :  { %v112_v5 = vsub.s32 0, %v110_v4  ;;  %v139_v31 = vadd.s32 3, %v135_v30 }
  0x62   :  { %v173_v6 = vmin.u32 %v112_v5, %v110_v4  ;;  %v140_v32 = vand.u32 3, %v139_v31 }
  0x64   :  { %v114_v7 = vclz %v173_v6  ;;  %vm145_vm10 = vcmp.eq.s32.totalorder %v140_v32, 2  ;;  %vm142_vm11 = vcmp.eq.s32.totalorder %v140_v32, 0  ;;  %vm141_vm12 = vcmp.lt.s32.totalorder %v140_v32, 2 }
  0x66   :  { %v174_v10 = vadd.s32 4294967294, %v114_v7 }
  0x68   :  { %vm175_vm7 = vcmp.lt.s32.totalorder %v174_v10, 0 }
  0x69   :  { %v117_v13 = vsel %vm175_vm7, 0, %v174_v10 }
  0x6a   :  { %v118_v14 = vsub.s32 32, %v117_v13  ;;  %v119_v15 = vshll.u32 %v110_v4, %v117_v13  ;;  %v122_v16 = vsub.s32 4294967266, %v117_v13 }
  0x6c   :  { %v120_v17 = vshrl.u32 %v102_v11, %v118_v14  ;;  %v123_v18 = vadd.s32 127, %v122_v16 }
  0x6e   :  { %v121_v19 = vor.u32 %v120_v17, %v119_v15  ;;  %v124_v20 = vshll.u32 %v123_v18, 23 }
  0x70   :  { %v125_v21 = vor.u32 4788187, %v124_v20  ;;  %v128_v22 = vcvt.s32.f32 %v121_v19 }
  0x72   :  { %v126_v23 = vand.u32 2147483647, %v125_v21 }
  0x74   :  { %v129_v25 = vmul.f32 %v128_v22, %v126_v23 }
  0x76   :  { %v130_v26 = vxor.u32 2147483648, %v129_v25 }
  0x78   :  { %v131_v28 = vsel %vm48_vm8, %v130_v26, %v129_v25 }
  0x79   :  { %v134_v29 = vsel %vm47_vm9, %v326_v9, %v131_v28 }
  0x7a   :  { %191 = vcosq.f32 %v134_v29 }
  0x7b   :  { %193 = vsinq.f32 %v134_v29 }
  0x7c   :  { %195 = vrcp.f32 %v326_v9 }
  0x84   :  { %v192_v33 = vpop.eup %191 }
  0x85   :  { %v194_v34 = vpop.eup %193  ;;  %v146_v35 = vxor.u32 2147483648, %v192_v33 }
  0x86   :  { %v143_v36 = vxor.u32 2147483648, %v194_v34  ;;  %v196_v37 = vpop.eup %195 }
  0x87   :  { %v147_v12 = vsel %vm145_vm10, %v146_v35, %v194_v34 }
  0x88   :  { %v144_v38 = vsel %vm142_vm11, %v192_v33, %v143_v36 }
  0x89   :  { %v148_v39 = vsel %vm141_vm12, %v144_v38, %v147_v12 }
  0x8a   :  { %v149_v40 = vsel %vm138_vm13, nan, %v148_v39 }
  0x8b   :  { %v151_v41 = vmul.f32 %v196_v37, %v149_v40 }
  0x8d   :  { %v152_v42 = vsel %vm320_vm0, 1.0, %v151_v41 }
  0x8e   :  { %v154_v43 = vsel %vm153_vm14, %v152_v42, 0.0 }
  0x8f   :  { %155 = vst [vmem:[#allocation7] sm:$0xff] %v154_v43 }
  0x90   :  { %252 = shalt.err (!%p249_p6)
}
  0x91   :  { %s253_s8 = scalar_lea.hbm %s365_s2, 128 }
  0x92   :  { %p254_p7 = scmp.ne.s32.totalorder %s365_s2, %s253_s8  ;;  %p257_p8 = scmp.lt.u32.totalorder %s253_s8, %s365_s2 }
  0x94   :  { %p259_p9 = pnand %p257_p8, %p254_p7 }
  0x96   :  { %262 = shalt.err (!%p259_p9)
}
  0x97   :  { %165 = dma.vmem_to_hbm [thread:$0]  %s163_s4, 128, %s365_s2, [#allocation4]  }
  0x98   :  { %267 = dma.done.wait [#allocation4], 128  }
  0x99   :  { %268 = vsyncadd [#allocation4], 4294967168 }
  0x9a   :  { %169 = vsyncpa [#allocation3], 1 }
  0x9b   :  { %170 = vsyncpa [#allocation6], 1 }
  0x9c   :  { %171 = vsyncpa [#allocation4], 1 }

</bundles_post_ra>
